<compile_context>
chip_gen: v7x
topology: tpu7x:2x2x1
jax: 0.10.0
libtpu: 0.0.40
codegen_flags: <defaults>
</compile_context>

<pallas_src>
import functools

import jax
import jax.numpy as jnp
from jax import lax
from jax.experimental import pallas as pl
from jax.experimental.pallas import tpu as pltpu


# --------------------------------------------------------------------------- #
# Fused per-layer MB-TCN kernel
#   stage0 (all branches, one matmul) -> stage1 (all branches, one matmul)
#   -> residual (identity or 1x1 conv) -> ReLU -> [optional fused masked mean]
# --------------------------------------------------------------------------- #
def _mb_layer_kernel(x_ref, w0_ref, s0_ref, w1_ref, s1_ref, *rest,
                     kmax, dilation, has_down, is_last):
    idx = 0
    if has_down:
        wd_ref, sd_ref = rest[idx], rest[idx + 1]
        idx += 2
    if is_last:
        lens_ref = rest[idx]
        idx += 1
    o_ref = rest[idx]
    xpad, h0pad = rest[idx + 1], rest[idx + 2]

    Bt, T, cin = x_ref.shape
    out_ch = o_ref.shape[2]
    maxpad = (kmax - 1) * dilation

    x = x_ref[...]

    # ---- causal halo in VMEM scratch: zero head + copy body (no XLA-side pad) ----
    if maxpad > 0:
        xpad[:, pl.ds(0, maxpad), :] = jnp.zeros((Bt, maxpad, cin), jnp.float32)
    xpad[:, pl.ds(maxpad, T), :] = x

    # ---- stage 0: all branches as one im2col matmul (BN scale folded into W0) ----
    cols0 = jnp.concatenate(
        [xpad[:, pl.ds(m * dilation, T), :] for m in range(kmax)], axis=-1)
    h0 = lax.dot_general(cols0, w0_ref[...],
                         dimension_numbers=(((2,), (0,)), ((), ())),
                         preferred_element_type=jnp.float32)
    h0 = jnp.maximum(h0 + s0_ref[...], 0.0)                       # conv+BN(+bias)+ReLU

    # ---- stage 1 (input = concatenated stage-0 output, already lane-dense) ----
    if maxpad > 0:
        h0pad[:, pl.ds(0, maxpad), :] = jnp.zeros((Bt, maxpad, out_ch), jnp.float32)
    h0pad[:, pl.ds(maxpad, T), :] = h0
    cols1 = jnp.concatenate(
        [h0pad[:, pl.ds(m * dilation, T), :] for m in range(kmax)], axis=-1)
    h1 = lax.dot_general(cols1, w1_ref[...],
                         dimension_numbers=(((2,), (0,)), ((), ())),
                         preferred_element_type=jnp.float32)
    h1 = jnp.maximum(h1 + s1_ref[...], 0.0)

    # ---- residual + final ReLU ----
    if has_down:
        res = lax.dot_general(x, wd_ref[...],
                              dimension_numbers=(((2,), (0,)), ((), ())),
                              preferred_element_type=jnp.float32) + sd_ref[...]
    else:
        res = x
    y = jnp.maximum(h1 + res, 0.0)

    if is_last:
        # fused _average_batch: mean over t in [0, lengths[b]) — vectorized over batch
        lens = lens_ref[...]                                           # (Bt,1,1) int32
        t_idx = lax.broadcasted_iota(jnp.int32, (Bt, T, out_ch), 1)
        masked = jnp.where(t_idx < lens, y, 0.0)
        s = jnp.sum(masked, axis=1, keepdims=True)                     # (Bt,1,out_ch)
        denom = jnp.maximum(lens.astype(jnp.float32), 1.0)             # zero-length guard
        o_ref[...] = (s / denom).astype(o_ref.dtype)
    else:
        o_ref[...] = y.astype(o_ref.dtype)


def mb_tcn_layer(x, lp, lens4=None):
    """One fused MB-TCN layer.  x:(4B,T,Cin) -> (4B,T,out_ch), or (4B,1,out_ch) if last."""
    Bf, T, cin = x.shape
    out_ch = lp['s0'].shape[-1]
    kmax = lp['kmax']
    dilation = lp['dilation']
    maxpad = (kmax - 1) * dilation
    has_down = lp['wd'] is not None
    is_last = lens4 is not None

    # Tile the stream-batch axis -> software pipelining + megacore-shardable grid.
    if Bf % 4 == 0 and Bf >= 8:
        block_b = Bf // 4
    elif Bf % 2 == 0:
        block_b = Bf // 2
    else:
        block_b = Bf
    grid = (Bf // block_b,)

    in_specs = [
        pl.BlockSpec((block_b, T, cin), lambda i: (i, 0, 0)),
        pl.BlockSpec((kmax * cin, out_ch), lambda i: (0, 0)),
        pl.BlockSpec((1, out_ch), lambda i: (0, 0)),
        pl.BlockSpec((kmax * out_ch, out_ch), lambda i: (0, 0)),
        pl.BlockSpec((1, out_ch), lambda i: (0, 0)),
    ]
    args = [x, lp['w0'], lp['s0'], lp['w1'], lp['s1']]
    if has_down:
        in_specs += [pl.BlockSpec((cin, out_ch), lambda i: (0, 0)),
                     pl.BlockSpec((1, out_ch), lambda i: (0, 0))]
        args += [lp['wd'], lp['sd']]
    if is_last:
        in_specs += [pl.BlockSpec((block_b, 1, 1), lambda i: (i, 0, 0))]
        args += [lens4]
        out_shape = jax.ShapeDtypeStruct((Bf, 1, out_ch), jnp.float32)
        out_spec = pl.BlockSpec((block_b, 1, out_ch), lambda i: (i, 0, 0))
    else:
        out_shape = jax.ShapeDtypeStruct((Bf, T, out_ch), jnp.float32)
        out_spec = pl.BlockSpec((block_b, T, out_ch), lambda i: (i, 0, 0))

    kern = functools.partial(_mb_layer_kernel, kmax=kmax, dilation=dilation,
                             has_down=has_down, is_last=is_last)
    return pl.pallas_call(
        kern,
        out_shape=out_shape,
        grid_spec=pltpu.PrefetchScalarGridSpec(
            num_scalar_prefetch=0,
            grid=grid,
            in_specs=in_specs,
            out_specs=out_spec,
            scratch_shapes=[pltpu.VMEM((block_b, T + maxpad, cin), jnp.float32),
                            pltpu.VMEM((block_b, T + maxpad, out_ch), jnp.float32)]),
        compiler_params=pltpu.CompilerParams(dimension_semantics=("parallel",)),
    )(*args)


# --------------------------------------------------------------------------- #
# APFF fusion + shared Linear head (both heads in one MXU pass)
# --------------------------------------------------------------------------- #
def _apff_linear_kernel(means_ref, w_ref, b_ref, main_ref, branch_ref, *, B):
    mm = means_ref[...]                                   # (4B, C): [x; a; b; c] blocks
    out, o1 = mm[0:B], mm[B:2 * B]
    o2, o3 = mm[2 * B:3 * B], mm[3 * B:4 * B]

    w1 = jnp.mean(out * o1, axis=1, keepdims=True)        # (B, 1)
    w2 = jnp.mean(out * o2, axis=1, keepdims=True)
    w3 = jnp.mean(out * o3, axis=1, keepdims=True)
    m = jnp.maximum(jnp.maximum(w1, w2), w3)               # softmax over the 3 scores
    e1, e2, e3 = jnp.exp(w1 - m), jnp.exp(w2 - m), jnp.exp(w3 - m)
    inv = pl.reciprocal(e1 + e2 + e3, approx=True)         # divide -> EUP slot
    out_branch = (o1 * e1 + o2 * e2 + o3 * e3) * inv

    stacked = jnp.concatenate([out, out_branch], axis=0)   # (2B, C): one weight load
    logits = jnp.dot(stacked, w_ref[...],
                     preferred_element_type=jnp.float32) + b_ref[...]
    main_ref[...] = logits[0:B]
    branch_ref[...] = logits[B:2 * B]


def apff_and_linear(means, fc_w, fc_b, *, B, num_classes):
    fourB, C = means.shape
    ncp = ((num_classes + 127) // 128) * 128               # lane-dense class dim
    w_pad = jnp.zeros((C, ncp), jnp.float32).at[:, :num_classes].set(fc_w)
    b_pad = jnp.zeros((1, ncp), jnp.float32).at[:, :num_classes].set(fc_b.reshape(1, -1))
    main_p, branch_p = pl.pallas_call(
        functools.partial(_apff_linear_kernel, B=B),
        out_shape=(jax.ShapeDtypeStruct((B, ncp), jnp.float32),
                   jax.ShapeDtypeStruct((B, ncp), jnp.float32)),
        grid=(1,),
        in_specs=[pl.BlockSpec((fourB, C), lambda i: (0, 0)),
                  pl.BlockSpec((C, ncp), lambda i: (0, 0)),
                  pl.BlockSpec((1, ncp), lambda i: (0, 0))],
        out_specs=(pl.BlockSpec((B, ncp), lambda i: (0, 0)),
                   pl.BlockSpec((B, ncp), lambda i: (0, 0))),
    )(means, w_pad, b_pad)
    return main_p[:, :num_classes], branch_p[:, :num_classes]


# --------------------------------------------------------------------------- #
# Parameter construction: merge branches per stage, fold inference BatchNorm
# --------------------------------------------------------------------------- #
def init_mb_tcn_params(key, input_size, num_channels, kernel_sizes):
    eps = 1e-5
    nk = len(kernel_sizes)
    kmax = max(kernel_sizes)
    layers = []
    for i, out_ch in enumerate(num_channels):
        in_ch = input_size if i == 0 else num_channels[i - 1]
        assert out_ch % nk == 0
        bo = out_ch // nk
        dilation = 2 ** i

        def make_stage(cin, key):
            # Combined weight: (kmax*cin, out_ch); branch with kernel k uses taps
            # [kmax-k, kmax) of the max-dilated im2col window (zeros elsewhere).
            w_full = jnp.zeros((kmax, cin, out_ch), jnp.float32)
            shift_full = jnp.zeros((1, out_ch), jnp.float32)
            for b_idx, k in enumerate(kernel_sizes):
                key, kw, kb = jax.random.split(key, 3)
                w = (jax.random.normal(kw, (k, cin, bo)) * 0.1).astype(jnp.float32)
                bias = (jax.random.normal(kb, (bo,)) * 0.1).astype(jnp.float32)
                gamma = jnp.ones((bo,), jnp.float32)
                beta = jnp.zeros((bo,), jnp.float32)
                mean = jnp.zeros((bo,), jnp.float32)
                var = jnp.ones((bo,), jnp.float32)
                scale = gamma / jnp.sqrt(var + eps)          # folded inference BatchNorm
                shift = beta + (bias - mean) * scale
                w_full = w_full.at[kmax - k:, :, b_idx * bo:(b_idx + 1) * bo].set(w * scale)
                shift_full = shift_full.at[:, b_idx * bo:(b_idx + 1) * bo].set(
                    shift.reshape(1, -1))
            return w_full.reshape(kmax * cin, out_ch), shift_full, key

        w0, s0, key = make_stage(in_ch, key)
        w1, s1, key = make_stage(out_ch, key)

        wd = sd = None
        if in_ch != out_ch:                                   # 1x1 conv residual downsample
            key, kw, kb = jax.random.split(key, 3)
            wd = (jax.random.normal(kw, (in_ch, out_ch)) * 0.1).astype(jnp.float32)
            sd = (jax.random.normal(kb, (1, out_ch)) * 0.1).astype(jnp.float32)

        layers.append({'w0': w0, 's0': s0, 'w1': w1, 's1': s1,
                       'wd': wd, 'sd': sd, 'kmax': kmax, 'dilation': dilation})
    return layers, key


# --------------------------------------------------------------------------- #
# Full forward: batch the 4 streams, run the TCN once, fused mean, APFF + Linear
# --------------------------------------------------------------------------- #
def multiscale_multibranch_tcn(params, x, a, b, c, lengths):
    """Returns (main, branch), matching MultiscaleMultibranchTCN.forward."""
    B, T, _ = x.shape
    xs = jnp.concatenate([x, a, b, c], axis=0)                        # (4B, T, Cin)
    lens4 = jnp.tile(lengths.astype(jnp.int32), 4).reshape(4 * B, 1, 1)

    layers = params['tcn']
    y = xs
    for li, lp in enumerate(layers):
        last = (li == len(layers) - 1)
        y = mb_tcn_layer(y, lp, lens4 if last else None)              # last: (4B,1,C)
    means = y.reshape(4 * B, -1)                                      # (4B, C_last)

    return apff_and_linear(means, params['fc_w'], params['fc_b'],
                           B=B, num_classes=params['fc_w'].shape[1])


# --------------------------------------------------------------------------- #
if __name__ == "__main__":
    B, T, input_size = 2, 8, 16
    num_channels = [24, 24]       # num_channels[-1] must be divisible by len(kernel_sizes)
    kernel_sizes = [3, 5]
    num_classes = 10

    key = jax.random.PRNGKey(0)
    tcn_params, key = init_mb_tcn_params(key, input_size, num_channels, kernel_sizes)
    key, kfw, kfb = jax.random.split(key, 3)
    fc_w = (jax.random.normal(kfw, (num_channels[-1], num_classes)) * 0.1).astype(jnp.float32)
    fc_b = (jax.random.normal(kfb, (num_classes,)) * 0.1).astype(jnp.float32)
    params = {'tcn': tcn_params, 'fc_w': fc_w, 'fc_b': fc_b}

    key, kx, ka, kb2, kc = jax.random.split(key, 5)
    x = jax.random.normal(kx, (B, T, input_size), jnp.float32)
    a = jax.random.normal(ka, (B, T, input_size), jnp.float32)
    b = jax.random.normal(kb2, (B, T, input_size), jnp.float32)
    c = jax.random.normal(kc, (B, T, input_size), jnp.float32)
    lengths = jnp.array([6, 8], dtype=jnp.int32)

    main, branch = multiscale_multibranch_tcn(params, x, a, b, c, lengths)
    jax.block_until_ready((main, branch))
    assert main.shape == (B, num_classes) and branch.shape == (B, num_classes)
    assert bool(jnp.all(jnp.isfinite(main))) and bool(jnp.all(jnp.isfinite(branch)))
    print("KERNEL_OK")
</pallas_src>

<mosaic_0001>
module attributes {stable_mosaic.version = 11 : i64} {
  func.func @_mb_layer_kernel(%arg0: i32, %arg1: memref<2x8x16xf32, #tpu.memory_space<vmem>>, %arg2: memref<80x24xf32, #tpu.memory_space<vmem>>, %arg3: memref<1x24xf32, #tpu.memory_space<vmem>>, %arg4: memref<120x24xf32, #tpu.memory_space<vmem>>, %arg5: memref<1x24xf32, #tpu.memory_space<vmem>>, %arg6: memref<16x24xf32, #tpu.memory_space<vmem>>, %arg7: memref<1x24xf32, #tpu.memory_space<vmem>>, %arg8: memref<2x8x24xf32, #tpu.memory_space<vmem>>, %arg9: memref<2x12x16xf32, #tpu.memory_space<vmem>>, %arg10: memref<2x12x24xf32, #tpu.memory_space<vmem>>) attributes {dimension_semantics = [#tpu.dimension_semantics<parallel>], iteration_bounds = array<i64: 4>, scalar_prefetch = 0 : i64, scratch_operands = 2 : i64, tpu.core_type = #tpu.core_type<tc>, window_params = [{transform_indices = @transform_0, window_bounds = array<i64: 2, 8, 16>}, {pipeline_mode = #tpu.pipeline_mode<synchronous>, transform_indices = @transform_1, window_bounds = array<i64: 80, 24>}, {pipeline_mode = #tpu.pipeline_mode<synchronous>, transform_indices = @transform_2, window_bounds = array<i64: 1, 24>}, {pipeline_mode = #tpu.pipeline_mode<synchronous>, transform_indices = @transform_3, window_bounds = array<i64: 120, 24>}, {pipeline_mode = #tpu.pipeline_mode<synchronous>, transform_indices = @transform_4, window_bounds = array<i64: 1, 24>}, {pipeline_mode = #tpu.pipeline_mode<synchronous>, transform_indices = @transform_5, window_bounds = array<i64: 16, 24>}, {pipeline_mode = #tpu.pipeline_mode<synchronous>, transform_indices = @transform_6, window_bounds = array<i64: 1, 24>}, {transform_indices = @transform_7, window_bounds = array<i64: 2, 8, 24>}]} {
    %c0 = arith.constant 0 : index
    %c0_0 = arith.constant 0 : index
    %c0_1 = arith.constant 0 : index
    %0 = vector.load %arg1[%c0, %c0_0, %c0_1] : memref<2x8x16xf32, #tpu.memory_space<vmem>>, vector<2x8x16xf32>
    %cst = arith.constant 0.000000e+00 : f32
    %1 = vector.broadcast %cst : f32 to vector<2x4x16xf32>
    %c0_2 = arith.constant 0 : index
    %c0_3 = arith.constant 0 : index
    %c0_4 = arith.constant 0 : index
    %2 = vector.load %arg9[%c0_2, %c0_3, %c0_4] : memref<2x12x16xf32, #tpu.memory_space<vmem>>, vector<2x4x16xf32>
    tpu.vector_store %arg9[%c0_2, %c0_3, %c0_4], %1 {strides = array<i32>} : memref<2x12x16xf32, #tpu.memory_space<vmem>>, vector<2x4x16xf32>,
    %c0_5 = arith.constant 0 : index
    %c4 = arith.constant 4 : index
    %c0_6 = arith.constant 0 : index
    %3 = vector.load %arg9[%c0_5, %c4, %c0_6] : memref<2x12x16xf32, #tpu.memory_space<vmem>>, vector<2x8x16xf32>
    tpu.vector_store %arg9[%c0_5, %c4, %c0_6], %0 {strides = array<i32>} : memref<2x12x16xf32, #tpu.memory_space<vmem>>, vector<2x8x16xf32>,
    %c0_7 = arith.constant 0 : index
    %c0_8 = arith.constant 0 : index
    %c0_9 = arith.constant 0 : index
    %4 = vector.load %arg9[%c0_7, %c0_8, %c0_9] : memref<2x12x16xf32, #tpu.memory_space<vmem>>, vector<2x8x16xf32>
    %c0_10 = arith.constant 0 : index
    %c1 = arith.constant 1 : index
    %c0_11 = arith.constant 0 : index
    %5 = vector.load %arg9[%c0_10, %c1, %c0_11] : memref<2x12x16xf32, #tpu.memory_space<vmem>>, vector<2x8x16xf32>
    %c0_12 = arith.constant 0 : index
    %c2 = arith.constant 2 : index
    %c0_13 = arith.constant 0 : index
    %6 = vector.load %arg9[%c0_12, %c2, %c0_13] : memref<2x12x16xf32, #tpu.memory_space<vmem>>, vector<2x8x16xf32>
    %c0_14 = arith.constant 0 : index
    %c3 = arith.constant 3 : index
    %c0_15 = arith.constant 0 : index
    %7 = vector.load %arg9[%c0_14, %c3, %c0_15] : memref<2x12x16xf32, #tpu.memory_space<vmem>>, vector<2x8x16xf32>
    %c0_16 = arith.constant 0 : index
    %c4_17 = arith.constant 4 : index
    %c0_18 = arith.constant 0 : index
    %8 = vector.load %arg9[%c0_16, %c4_17, %c0_18] : memref<2x12x16xf32, #tpu.memory_space<vmem>>, vector<2x8x16xf32>
    %9 = tpu.concatenate %4, %5, %6, %7, %8 in 2 : vector<2x8x16xf32>, vector<2x8x16xf32>, vector<2x8x16xf32>, vector<2x8x16xf32>, vector<2x8x16xf32> -> vector<2x8x80xf32>
    %c0_19 = arith.constant 0 : index
    %c0_20 = arith.constant 0 : index
    %10 = vector.load %arg2[%c0_19, %c0_20] : memref<80x24xf32, #tpu.memory_space<vmem>>, vector<80x24xf32>
    %cst_21 = arith.constant dense<0.000000e+00> : vector<2x8x24xf32>
    %11 = tpu.matmul %9, %10, %cst_21 {dimension_numbers = #tpu.dot_dimension_numbers<[2], [0], [0, 1], [1], [0, 0, 0, 1, 1, 1], [], []>} : vector<2x8x80xf32>, vector<80x24xf32>, vector<2x8x24xf32> -> vector<2x8x24xf32>
    %c0_22 = arith.constant 0 : index
    %c0_23 = arith.constant 0 : index
    %12 = vector.load %arg3[%c0_22, %c0_23] : memref<1x24xf32, #tpu.memory_space<vmem>>, vector<1x24xf32>
    %13 = vector.shape_cast %12 : vector<1x24xf32> to vector<1x1x24xf32>
    %14 = vector.broadcast %13 : vector<1x1x24xf32> to vector<2x8x24xf32>
    %15 = arith.addf %11, %14 : vector<2x8x24xf32>
    %cst_24 = arith.constant 0.000000e+00 : f32
    %16 = vector.broadcast %cst_24 : f32 to vector<2x8x24xf32>
    %17 = arith.maximumf %15, %16 : vector<2x8x24xf32>
    %cst_25 = arith.constant 0.000000e+00 : f32
    %18 = vector.broadcast %cst_25 : f32 to vector<2x4x24xf32>
    %c0_26 = arith.constant 0 : index
    %c0_27 = arith.constant 0 : index
    %c0_28 = arith.constant 0 : index
    %19 = vector.load %arg10[%c0_26, %c0_27, %c0_28] : memref<2x12x24xf32, #tpu.memory_space<vmem>>, vector<2x4x24xf32>
    tpu.vector_store %arg10[%c0_26, %c0_27, %c0_28], %18 {strides = array<i32>} : memref<2x12x24xf32, #tpu.memory_space<vmem>>, vector<2x4x24xf32>,
    %c0_29 = arith.constant 0 : index
    %c4_30 = arith.constant 4 : index
    %c0_31 = arith.constant 0 : index
    %20 = vector.load %arg10[%c0_29, %c4_30, %c0_31] : memref<2x12x24xf32, #tpu.memory_space<vmem>>, vector<2x8x24xf32>
    tpu.vector_store %arg10[%c0_29, %c4_30, %c0_31], %17 {strides = array<i32>} : memref<2x12x24xf32, #tpu.memory_space<vmem>>, vector<2x8x24xf32>,
    %c0_32 = arith.constant 0 : index
    %c0_33 = arith.constant 0 : index
    %c0_34 = arith.constant 0 : index
    %21 = vector.load %arg10[%c0_32, %c0_33, %c0_34] : memref<2x12x24xf32, #tpu.memory_space<vmem>>, vector<2x8x24xf32>
    %c0_35 = arith.constant 0 : index
    %c1_36 = arith.constant 1 : index
    %c0_37 = arith.constant 0 : index
    %22 = vector.load %arg10[%c0_35, %c1_36, %c0_37] : memref<2x12x24xf32, #tpu.memory_space<vmem>>, vector<2x8x24xf32>
    %c0_38 = arith.constant 0 : index
    %c2_39 = arith.constant 2 : index
    %c0_40 = arith.constant 0 : index
    %23 = vector.load %arg10[%c0_38, %c2_39, %c0_40] : memref<2x12x24xf32, #tpu.memory_space<vmem>>, vector<2x8x24xf32>
    %c0_41 = arith.constant 0 : index
    %c3_42 = arith.constant 3 : index
    %c0_43 = arith.constant 0 : index
    %24 = vector.load %arg10[%c0_41, %c3_42, %c0_43] : memref<2x12x24xf32, #tpu.memory_space<vmem>>, vector<2x8x24xf32>
    %c0_44 = arith.constant 0 : index
    %c4_45 = arith.constant 4 : index
    %c0_46 = arith.constant 0 : index
    %25 = vector.load %arg10[%c0_44, %c4_45, %c0_46] : memref<2x12x24xf32, #tpu.memory_space<vmem>>, vector<2x8x24xf32>
    %26 = tpu.concatenate %21, %22, %23, %24, %25 in 2 : vector<2x8x24xf32>, vector<2x8x24xf32>, vector<2x8x24xf32>, vector<2x8x24xf32>, vector<2x8x24xf32> -> vector<2x8x120xf32>
    %c0_47 = arith.constant 0 : index
    %c0_48 = arith.constant 0 : index
    %27 = vector.load %arg4[%c0_47, %c0_48] : memref<120x24xf32, #tpu.memory_space<vmem>>, vector<120x24xf32>
    %cst_49 = arith.constant dense<0.000000e+00> : vector<2x8x24xf32>
    %28 = tpu.matmul %26, %27, %cst_49 {dimension_numbers = #tpu.dot_dimension_numbers<[2], [0], [0, 1], [1], [0, 0, 0, 1, 1, 1], [], []>} : vector<2x8x120xf32>, vector<120x24xf32>, vector<2x8x24xf32> -> vector<2x8x24xf32>
    %c0_50 = arith.constant 0 : index
    %c0_51 = arith.constant 0 : index
    %29 = vector.load %arg5[%c0_50, %c0_51] : memref<1x24xf32, #tpu.memory_space<vmem>>, vector<1x24xf32>
    %30 = vector.shape_cast %29 : vector<1x24xf32> to vector<1x1x24xf32>
    %31 = vector.broadcast %30 : vector<1x1x24xf32> to vector<2x8x24xf32>
    %32 = arith.addf %28, %31 : vector<2x8x24xf32>
    %cst_52 = arith.constant 0.000000e+00 : f32
    %33 = vector.broadcast %cst_52 : f32 to vector<2x8x24xf32>
    %34 = arith.maximumf %32, %33 : vector<2x8x24xf32>
    %c0_53 = arith.constant 0 : index
    %c0_54 = arith.constant 0 : index
    %35 = vector.load %arg6[%c0_53, %c0_54] : memref<16x24xf32, #tpu.memory_space<vmem>>, vector<16x24xf32>
    %cst_55 = arith.constant dense<0.000000e+00> : vector<2x8x24xf32>
    %36 = tpu.matmul %0, %35, %cst_55 {dimension_numbers = #tpu.dot_dimension_numbers<[2], [0], [0, 1], [1], [0, 0, 0, 1, 1, 1], [], []>} : vector<2x8x16xf32>, vector<16x24xf32>, vector<2x8x24xf32> -> vector<2x8x24xf32>
    %c0_56 = arith.constant 0 : index
    %c0_57 = arith.constant 0 : index
    %37 = vector.load %arg7[%c0_56, %c0_57] : memref<1x24xf32, #tpu.memory_space<vmem>>, vector<1x24xf32>
    %38 = vector.shape_cast %37 : vector<1x24xf32> to vector<1x1x24xf32>
    %39 = vector.broadcast %38 : vector<1x1x24xf32> to vector<2x8x24xf32>
    %40 = arith.addf %36, %39 : vector<2x8x24xf32>
    %41 = arith.addf %34, %40 : vector<2x8x24xf32>
    %cst_58 = arith.constant 0.000000e+00 : f32
    %42 = vector.broadcast %cst_58 : f32 to vector<2x8x24xf32>
    %43 = arith.maximumf %41, %42 : vector<2x8x24xf32>
    %c0_59 = arith.constant 0 : index
    %c0_60 = arith.constant 0 : index
    %c0_61 = arith.constant 0 : index
    %44 = vector.load %arg8[%c0_59, %c0_60, %c0_61] : memref<2x8x24xf32, #tpu.memory_space<vmem>>, vector<2x8x24xf32>
    tpu.vector_store %arg8[%c0_59, %c0_60, %c0_61], %43 {strides = array<i32>} : memref<2x8x24xf32, #tpu.memory_space<vmem>>, vector<2x8x24xf32>,
    return
  }
  func.func @transform_0(%arg0: i32) -> (i32, i32, i32) {
    %c0_i32 = arith.constant 0 : i32
    %c0_i32_0 = arith.constant 0 : i32
    %c0_i32_1 = arith.constant 0 : i32
    return %arg0, %c0_i32, %c0_i32_0 : i32, i32, i32
  }
  func.func @transform_1(%arg0: i32) -> (i32, i32) {
    %c0_i32 = arith.constant 0 : i32
    %c0_i32_0 = arith.constant 0 : i32
    %c0_i32_1 = arith.constant 0 : i32
    return %c0_i32, %c0_i32_0 : i32, i32
  }
  func.func @transform_2(%arg0: i32) -> (i32, i32) {
    %c0_i32 = arith.constant 0 : i32
    %c0_i32_0 = arith.constant 0 : i32
    %c0_i32_1 = arith.constant 0 : i32
    return %c0_i32, %c0_i32_0 : i32, i32
  }
  func.func @transform_3(%arg0: i32) -> (i32, i32) {
    %c0_i32 = arith.constant 0 : i32
    %c0_i32_0 = arith.constant 0 : i32
    %c0_i32_1 = arith.constant 0 : i32
    return %c0_i32, %c0_i32_0 : i32, i32
  }
  func.func @transform_4(%arg0: i32) -> (i32, i32) {
    %c0_i32 = arith.constant 0 : i32
    %c0_i32_0 = arith.constant 0 : i32
    %c0_i32_1 = arith.constant 0 : i32
    return %c0_i32, %c0_i32_0 : i32, i32
  }
  func.func @transform_5(%arg0: i32) -> (i32, i32) {
    %c0_i32 = arith.constant 0 : i32
    %c0_i32_0 = arith.constant 0 : i32
    %c0_i32_1 = arith.constant 0 : i32
    return %c0_i32, %c0_i32_0 : i32, i32
  }
  func.func @transform_6(%arg0: i32) -> (i32, i32) {
    %c0_i32 = arith.constant 0 : i32
    %c0_i32_0 = arith.constant 0 : i32
    %c0_i32_1 = arith.constant 0 : i32
    return %c0_i32, %c0_i32_0 : i32, i32
  }
  func.func @transform_7(%arg0: i32) -> (i32, i32, i32) {
    %c0_i32 = arith.constant 0 : i32
    %c0_i32_0 = arith.constant 0 : i32
    %c0_i32_1 = arith.constant 0 : i32
    return %arg0, %c0_i32, %c0_i32_0 : i32, i32, i32
  }
}

</mosaic_0001>

<bundles_post_ra>
// kernel: tpu_custom_call.1
= control target key start
LH: loop header
LB: loop body
LE: loop exit
PB: predicated region body
PF: predicated region fallthrough
CT: control target
= control target key end

     0   :  { %12 = vsyncpa [#allocation5], 0  ;;  %s1332_s0 = inlined_call_operand.vmem [shape: f32[8,8,16], index: 0, kind: input, shape index: {}]   ;;  %s1333_s1 = inlined_call_operand.vmem [shape: f32[80,24], index: 1, kind: input, shape index: {}]   ;;  %s1334_s2 = inlined_call_operand.vmem [shape: f32[1,24], index: 2, kind: input, shape index: {}]   ;;  %s1335_s3 = inlined_call_operand.vmem [shape: f32[120,24], index: 3, kind: input, shape index: {}]   ;;  %s1336_s4 = inlined_call_operand.vmem [shape: f32[1,24], index: 4, kind: input, shape index: {}]   ;;  %s1337_s5 = inlined_call_operand.vmem [shape: f32[16,24], index: 5, kind: input, shape index: {}]   ;;  %s1338_s6 = inlined_call_operand.vmem [shape: f32[1,24], index: 6, kind: input, shape index: {}]   ;;  %s1339_s7 = inlined_call_operand.hbm [shape: f32[8,8,24], index: 7, kind: output, shape index: {}]  }
   0x1   :  { %14 = vsyncpa [#allocation5 + $0x1], 0  ;;  %s1112_s24 = smov 0   ;;  %s1114_s25 = smov 0  }
   0x2   :  { %s1116_s26 = smov 0   ;;  %s1118_s27 = smov 0  }
   0x3 LB: > { %s1133_s28 = sadd.s32 4294967295, %s1059_s27   ;;  %s778_s29 = sadd.s32 4294967294, %s1059_s27   ;;  %s1059_s27 = sphi %s1118_s27, %s1345_s27   ;;  %s1055_s26 = sphi %s1116_s26, %s1344_s26   ;;  %s1051_s25 = sphi %s1114_s25, %s1343_s25   ;;  %s1047_s24 = sphi %s1112_s24, %s1342_s24  }
   0x4   : > { %s1137_s30 = sadd.s32 1, %s1059_s27   ;;  %s179_s8 = sadd.s32 1, %s1055_s26 }
   0x5   : > { %s176_s9 = ssub.s32 %s1059_s27, %s1137_s30  ;;  %p189_p0 = scmp.ne.s32.totalorder %s1055_s26, %s1051_s25 }
   0x6   : > { %p177_p1 = scmp.eq.s32.totalorder %s176_s9, 0  ;;  %p190_p2 = scmp.eq.s32.totalorder %s1133_s28, 3 }
   0x7   : > { %p195_p3 = scmp.ne.s32.totalorder %s1051_s25, %s1047_s24  ;;  %p196_p4 = scmp.eq.s32.totalorder %s778_s29, 3 }
   0x8   : > { %s1148_s10 = scalar_select %p177_p1, %s1055_s26, %s179_s8  }
   0x9   : > { %p1150_p5 = por %p190_p2, %p189_p0  ;;  %p1154_p6 = por %p196_p4, %p195_p3 }
   0xa   : > { %p781_p7 = scmp.ge.s32.totalorder %s1059_s27, 1  ;;  %p241_p8 = scmp.lt.s32.totalorder %s1059_s27, 5 }
   0xc   : > { %p242_p9 = pnand %p781_p7, %p241_p8 }
   0xd   : > { %s783_s13 = sshll.u32 (!%p242_p9), %s1133_s28, 1  ;;  %vm282_vm0 = vcmask (!%p242_p9), 125952   ;;  %v341_v0 = vld [vmem:[%s1333_s1] sm:$0xff] (!%p242_p9)  ;;  %v1061_v1 = vmov (!%p242_p9), 0.0   ;;  %v342_v2 = vld [vmem:[%s1333_s1 + $0x8] sm:$0xff] (!%p242_p9)  ;;  %v343_v3 = vld [vmem:[%s1333_s1 + $0x10] sm:$0xff] (!%p242_p9) }
   0xe   : > { %245 = sbr.rel (%p242_p9) target bundleno = 753 (0x2f1), region = 48  ;;  %p274_p10 = scmp.lt.s32.totalorder (!%p242_p9), %s783_s13, 7  ;;  %283 = vst.msk [vmem:[#allocation2] sm:$0xf] (!%p242_p9), %vm282_vm0, %v1061_v1  ;;  %284 = vst.msk [vmem:[#allocation2 + $0x10] sm:$0xf] (!%p242_p9), %vm282_vm0, %v1061_v1  ;;  %v896_v5 = vpack.c.bf16 (!%p242_p9), %v342_v2, %v341_v0 }
   0xf   : > { %v344_v4 = vld [vmem:[%s1333_s1 + $0x18] sm:$0xff] (!%p242_p9)  ;;  %v345_v7 = vld [vmem:[%s1333_s1 + $0x20] sm:$0xff] (!%p242_p9)  ;;  %v346_v8 = vld [vmem:[%s1333_s1 + $0x28] sm:$0xff] (!%p242_p9)  ;;  %vm285_vm1 = vcmask (!%p242_p9), 130048   ;;  %s1062_s29 = smov (!%p242_p9), 32   ;;  %s1063_s8 = smov (!%p242_p9), 16  }
  0x10   : > { %v900_v6 = vpack.c.bf16 (!%p242_p9), %v344_v4, %v343_v3  ;;  %897 = vmatprep.subr.bf16.mxu0 (!%p242_p9), %v896_v5  ;;  %v904_v9 = vpack.c.bf16 (!%p242_p9), %v346_v8, %v345_v7  ;;  %v347_v10 = vld [vmem:[%s1333_s1 + $0x30] sm:$0xff] (!%p242_p9)  ;;  %v348_v13 = vld [vmem:[%s1333_s1 + $0x38] sm:$0xff] (!%p242_p9)  ;;  %v349_v15 = vld [vmem:[%s1333_s1 + $0x40] sm:$0xff] (!%p242_p9)  ;;  %s1065_s14 = smov (!%p242_p9), 64   ;;  %vm332_vm2 = vcmask (!%p242_p9), 261120   ;;  %vm335_vm3 = vcmask (!%p242_p9), 392192  }
  0x11   : > { %899 = vmatpush3.bf16.msra.mxu0 (!%p242_p9), %v896_v5  ;;  %v908_v14 = vpack.c.bf16 (!%p242_p9), %v348_v13, %v347_v10  ;;  %v350_v16 = vld [vmem:[%s1333_s1 + $0x48] sm:$0xff] (!%p242_p9)  ;;  %vm338_vm4 = vcmask (!%p242_p9), 523264   ;;  %vm358_vm5 = vcmask (!%p242_p9), 654336   ;;  %vm442_vm6 = vcmask (!%p242_p9), 191488   ;;  %v500_v44 = vld [vmem:[%s1335_s3] sm:$0xff] (!%p242_p9)  ;;  %v502_v46 = vld [vmem:[%s1335_s3 + $0x10] sm:$0xff] (!%p242_p9) }
  0x12   : > { %901 = vmatprep.subr.bf16.mxu0 (!%p242_p9), %v900_v6  ;;  %v912_v17 = vpack.c.bf16 (!%p242_p9), %v350_v16, %v349_v15  ;;  %444 = vst.msk [vmem:[#allocation3 + $0x10] sm:$0xf] (!%p242_p9), %vm442_vm6, %v1061_v1  ;;  %443 = vst.msk [vmem:[#allocation3] sm:$0xf] (!%p242_p9), %vm442_vm6, %v1061_v1  ;;  %v501_v45 = vld [vmem:[%s1335_s3 + $0x8] sm:$0xff] (!%p242_p9)  ;;  %v503_v48 = vld [vmem:[%s1335_s3 + $0x18] sm:$0xff] (!%p242_p9) }
  0x13   : > { %v916_v47 = vpack.c.bf16 (!%p242_p9), %v501_v45, %v500_v44  ;;  %v920_v49 = vpack.c.bf16 (!%p242_p9), %v503_v48, %v502_v46  ;;  %v504_v50 = vld [vmem:[%s1335_s3 + $0x20] sm:$0xff] (!%p242_p9)  ;;  %v505_v51 = vld [vmem:[%s1335_s3 + $0x28] sm:$0xff] (!%p242_p9)  ;;  %v506_v53 = vld [vmem:[%s1335_s3 + $0x30] sm:$0xff] (!%p242_p9)  ;;  %vm445_vm7 = vcmask (!%p242_p9), 195584   ;;  %s1066_s22 = smov (!%p242_p9), 24   ;;  %vm494_vm8 = vcmask (!%p242_p9), 588800  }
  0x14   : > { %v924_v52 = vpack.c.bf16 (!%p242_p9), %v505_v51, %v504_v50  ;;  %v507_v54 = vld [vmem:[%s1335_s3 + $0x38] sm:$0xff] (!%p242_p9)  ;;  %v785_v56 = vld [vmem:[%s1334_s2] ss:$0 sm:$0xff] (!%p242_p9)  ;;  %v509_v59 = vld [vmem:[%s1335_s3 + $0x48] sm:$0xff] (!%p242_p9)  ;;  %vm497_vm9 = vcmask (!%p242_p9), 785408   ;;  %vm522_vm10 = vcmask (!%p242_p9), 982016  }
  0x15   : > { %s1347_s13 = smov (!%p274_p10, %s783_s13), 7  ;;  %903 = vmatpush3.bf16.msra.mxu0 %v900_v6  ;;  %917 = vmatprep.subr.bf16.mxu1 %v916_v47  ;;  %v928_v55 = vpack.c.bf16 %v507_v54, %v506_v53  ;;  %v508_v58 = vld [vmem:[%s1335_s3 + $0x40] sm:$0xff]  ;;  %v510_v2 = vld [vmem:[%s1335_s3 + $0x50] sm:$0xff]  ;;  %v511_v3 = vld [vmem:[%s1335_s3 + $0x58] sm:$0xff]  ;;  %s799_s20 = sshll.u32 %s1133_s28, 8 }
  0x16   : > { %s784_s9 = sshll.u32 %s1347_s13, 3  ;;  %905 = vmatprep.subr.bf16.mxu0 %v904_v9  ;;  %919 = vmatpush3.bf16.msra.mxu1 %v916_v47  ;;  %v932_v62 = vpack.c.bf16 %v509_v59, %v508_v58  ;;  %v936_v4 = vpack.c.bf16 %v511_v3, %v510_v2  ;;  %v512_v5 = vld [vmem:[%s1335_s3 + $0x60] sm:$0xff]  ;;  %v513_v6 = vld [vmem:[%s1335_s3 + $0x68] sm:$0xff] }
  0x17   : > { %s277_s16 = scalar_lea.vmem %s1332_s0, %s784_s9  ;;  %s1064_s9 = smov 48   ;;  %921 = vmatprep.subr.bf16.mxu1 %v920_v49  ;;  %v940_v7 = vpack.c.bf16 %v513_v6, %v512_v5  ;;  %v606_v8 = vld [vmem:[%s1337_s5] sm:$0xff] }
  0x18   : > { %v280_v11 = vld [vmem:[%s277_s16] sm:$0xff]  ;;  %v1187_v12 = vld [vmem:[%s277_s16 + $0x8] sm:$0xff] }
  0x19   : > { %286 = vst.msk [vmem:[#allocation2 + $0x4] sm:$0xff] %vm285_vm1, %v280_v11  ;;  %287 = vst.msk [vmem:[#allocation2 + $0x14] sm:$0xff] %vm285_vm1, %v1187_v12  ;;  %907 = vmatpush3.bf16.msra.mxu0 %v904_v9  ;;  %v607_v9 = vld [vmem:[%s1337_s5 + $0x8] sm:$0xff] }
  0x1a   : > { %909 = vmatprep.subr.bf16.mxu0 %v908_v14  ;;  %923 = vmatpush3.bf16.msra.mxu1 %v920_v49 }
  0x1b   : > { %925 = vmatprep.subr.bf16.mxu1 %v924_v52 }
  0x1d   : > { %911 = vmatpush3.bf16.msra.mxu0 %v908_v14  ;;  %v514_v14 = vld [vmem:[%s1335_s3 + $0x70] sm:$0xff] }
  0x1e   : > { %913 = vmatprep.subr.bf16.mxu0 %v912_v17  ;;  %927 = vmatpush3.bf16.msra.mxu1 %v924_v52 }
  0x1f   : > { %929 = vmatprep.subr.bf16.mxu1 %v928_v55 }
  0x20   : > { %v292_v18 = vld [vmem:[#allocation2 + $0x2] sm:$0xff]  ;;  %v293_v20 = vld [vmem:[#allocation2 + $0x12] sm:$0xff] }
  0x21   : > { %v290_v19 = vld [vmem:[#allocation2 + $0x1] sm:$0xff]  ;;  %308 = vrot.lane.b32.xlu1 %v292_v18, %s1062_s29  ;;  %v291_v21 = vld [vmem:[#allocation2 + $0x11] sm:$0xff]  ;;  %915 = vmatpush3.bf16.msra.mxu0 %v912_v17 }
  0x22   : > { %300 = vrot.lane.b32.xlu0 %v290_v19, %s1063_s8  ;;  %v295_v22 = vld [vmem:[#allocation2 + $0x13] sm:$0xff]  ;;  %v294_v23 = vld [vmem:[#allocation2 + $0x3] sm:$0xff]  ;;  %931 = vmatpush3.bf16.msra.mxu1 %v928_v55 }
  0x23   : > { %v297_v24 = vld [vmem:[#allocation2 + $0x14] sm:$0xff]  ;;  %v296_v25 = vld [vmem:[#allocation2 + $0x4] sm:$0xff]  ;;  %933 = vmatprep.subr.bf16.mxu1 %v932_v62 }
  0x24   : > { %v288_v30 = vld [vmem:[#allocation2] sm:$0xff]  ;;  %v289_v31 = vld [vmem:[#allocation2 + $0x10] sm:$0xff] }
  0x25   : > { %310 = vrot.lane.b32.xlu1 %v293_v20, %s1062_s29  ;;  %s1285_s29 = scalar_lea.hbm %s1339_s7, %s799_s20 }
  0x26   : > { %302 = vrot.lane.b32.xlu0 %v291_v21, %s1063_s8  ;;  %935 = vmatpush3.bf16.msra.mxu1 %v932_v62  ;;  %s1067_s8 = smov 72  }
  0x27   : > { %937 = vmatprep.subr.bf16.mxu1 %v936_v4 }
  0x29   : > { %318 = vrot.lane.b32.xlu1 %v295_v22, %s1064_s9 }
  0x2a   : > { %316 = vrot.lane.b32.xlu0 %v294_v23, %s1064_s9  ;;  %939 = vmatpush3.bf16.msra.mxu1 %v936_v4 }
  0x2b   : > { %941 = vmatprep.subr.bf16.mxu1 %v940_v7 }
  0x2d   : > { %326 = vrot.lane.b32.xlu1 %v297_v24, %s1065_s14 }
  0x2e   : > { %324 = vrot.lane.b32.xlu0 %v296_v25, %s1065_s14  ;;  %943 = vmatpush3.bf16.msra.mxu1 %v940_v7  ;;  %s1068_s14 = smov 96  }
  0x2f   : > { %884 = vmatprep.subr.mxu1 %v514_v14 }
  0x32   : > { %885 = vmatpush3.msra.mxu1 %v514_v14 }
  0x93   : > { %v309_v26 = vpop.permute.xlu1 %308 }
  0x94   : > { %v301_v27 = vpop.permute.xlu0 %300 }
  0x95   : > { %v330_v32 = vsel %vm285_vm1, %v288_v30, %v301_v27 }
  0x96   : > { %v333_v37 = vsel %vm332_vm2, %v330_v32, %v309_v26 }
  0x97   : > { %v311_v28 = vpop.permute.xlu1 %310 }
  0x98   : > { %v303_v29 = vpop.permute.xlu0 %302 }
  0x99   : > { %v331_v33 = vsel %vm285_vm1, %v289_v31, %v303_v29 }
  0x9a   : > { %v334_v36 = vsel %vm332_vm2, %v331_v33, %v311_v28 }
  0x9b   : > { %v319_v34 = vpop.permute.xlu1 %318 }
  0x9c   : > { %v317_v35 = vpop.permute.xlu0 %316  ;;  %v337_v38 = vsel %vm335_vm3, %v334_v36, %v319_v34 }
  0x9d   : > { %v336_v39 = vsel %vm335_vm3, %v333_v37, %v317_v35 }
  0x9f   : > { %v327_v40 = vpop.permute.xlu1 %326 }
  0xa0   : > { %v325_v41 = vpop.permute.xlu0 %324  ;;  %v340_v42 = vsel %vm338_vm4, %v337_v38, %v327_v40  ;;  %v788_v40 = vld [vmem:[%s1336_s4] ss:$0 sm:$0xff] }
  0xa1   : > { %v339_v43 = vsel %vm338_vm4, %v336_v39, %v325_v41  ;;  %v791_v41 = vld [vmem:[%s1338_s6] ss:$0 sm:$0xff] }
  0xa2   : > { %853 = vmatprep.mubr.msk.f32.mxu0 %vm358_vm5, %v339_v43 }
  0xa3   : > { %854 = vmatmul.mubr.msk.f32.vlgmr.msra.gmra.mrb[0].mxu0 %vm358_vm5, %v340_v42 }
  0xa4   : > { %893 = vmatprep.mubr.msk.f32.mxu0 %vm285_vm1, %v280_v11  ;;  %v944_v11 = vpack.c.bf16 %v607_v9, %v606_v8 }
  0xa6   : > { %945 = vmatprep.subr.bf16.mxu0 %v944_v11 }
  0xa7   : > { %947 = vmatpush3.bf16.msra.mxu0 %v944_v11 }
  0xaa   : > { %894 = vmatmul.mubr.msk.f32.vlgmr.msra.gmra.mrb[2].mxu0 %vm285_vm1, %v1187_v12 }
 0x176   : > { %v855_v57 = vpop.f32.mrb[0].mxu0 }
 0x177   : > { %v437_v60 = vadd.f32 %v855_v57, %v785_v56  ;;  %v431_v61 = vpop.f32.mrb[1].mxu0 }
 0x178   : > { %v432_v63 = vadd.f32 %v785_v56, %v431_v61 }
 0x179   : > { %v441_v0 = vmax.f32 %v437_v60, 0.0 }
 0x17a   : > { %v440_v1 = vmax.f32 %v432_v63, 0.0 }
 0x17b   : > { %447 = vst.msk [vmem:[#allocation3 + $0x14] sm:$0xff] %vm445_vm7, %v441_v0 }
 0x17c   : > { %446 = vst.msk [vmem:[#allocation3 + $0x4] sm:$0xff] %vm445_vm7, %v440_v1 }
 0x17d   : > { %v895_v38 = vpop.f32.mrb[2].mxu0 }
 0x17e   : > { %v687_v39 = vpop.f32.mrb[3].mxu0  ;;  %v693_v45 = vadd.f32 %v895_v38, %v791_v41 }
 0x17f   : > { %v688_v47 = vadd.f32 %v791_v41, %v687_v39 }
 0x182   : > { %v451_v10 = vld [vmem:[#allocation3 + $0x11] sm:$0xff] }
 0x183   : > { %462 = vrot.lane.b32.xlu1 %v451_v10, %s1066_s22  ;;  %v450_v13 = vld [vmem:[#allocation3 + $0x1] sm:$0xff]  ;;  %v453_v15 = vld [vmem:[#allocation3 + $0x12] sm:$0xff] }
 0x184   : > { %460 = vrot.lane.b32.xlu0 %v450_v13, %s1066_s22  ;;  %v452_v16 = vld [vmem:[#allocation3 + $0x2] sm:$0xff]  ;;  %v455_v17 = vld [vmem:[#allocation3 + $0x13] sm:$0xff] }
 0x185   : > { %v454_v18 = vld [vmem:[#allocation3 + $0x3] sm:$0xff]  ;;  %v457_v19 = vld [vmem:[#allocation3 + $0x14] sm:$0xff] }
 0x186   : > { %v456_v20 = vld [vmem:[#allocation3 + $0x4] sm:$0xff]  ;;  %v449_v28 = vld [vmem:[#allocation3 + $0x10] sm:$0xff] }
 0x187   : > { %470 = vrot.lane.b32.xlu1 %v453_v15, %s1064_s9  ;;  %v448_v27 = vld [vmem:[#allocation3] sm:$0xff] }
 0x188   : > { %468 = vrot.lane.b32.xlu0 %v452_v16, %s1064_s9  ;;  %s270_s9 = sand.u32 1, %s1051_s25  }
 0x189   : > { %s782_s17 = sshll.u32 %s270_s9, 4  ;;  %s1291_s28 = scalar_lea.sflag [#allocation5], %s270_s9 }
 0x18a   : > { %s272_s13 = scalar_lea.vmem [#allocation4], %s782_s17 }
 0x18b   : > { %478 = vrot.lane.b32.xlu1 %v455_v17, %s1067_s8  ;;  %s716_s21 = sshll.u32 %s272_s13, 4  ;;  %s1287_s21 = int_to_ptr.vmem [resolvable:$true] %s716_s21 }
 0x18c   : > { %476 = vrot.lane.b32.xlu0 %v454_v18, %s1067_s8  ;;  %s997_s8 = scalar_lea.vmem %s1287_s21, 256 }
 0x18d   : > { %p998_p11 = scmp.ne.s32.totalorder %s1287_s21, %s997_s8 }
 0x18f   : > { %486 = vrot.lane.b32.xlu1 %v457_v19, %s1068_s14  ;;  %p999_p12 = pnand %p998_p11, %p1150_p5 }
 0x190   : > { %484 = vrot.lane.b32.xlu0 %v456_v20, %s1068_s14  ;;  %s1069_s14 = smov [#allocation4]  }
 0x191   : > { %p1000_p13 = pneg %p999_p12  ;;  %s1001_s15 = sshll.u32 %s1069_s14, 4  ;;  %s1002_s15 = int_to_ptr.vmem [resolvable:$false] %s1001_s15 }
 0x192   : > { %s1003_s16 = scalar_lea.vmem %s1002_s15, 512  ;;  %p1004_p0 = scmp.lt.s32.totalorder %s1287_s21, %s1002_s15 }
 0x193   : > { %p1005_p1 = scmp.lt.s32.totalorder %s1003_s16, %s997_s8 }
 0x195   : > { %p1006_p2 = por %p1005_p1, %p1004_p0 }
 0x197   : > { %p1007_p3 = pnand %p1006_p2, %p1000_p13 }
 0x1f5   : > { %v463_v21 = vpop.permute.xlu1 %462 }
 0x1f6   : > { %v461_v22 = vpop.permute.xlu0 %460  ;;  %v491_v29 = vsel %vm445_vm7, %v449_v28, %v463_v21 }
 0x1f7   : > { %v490_v12 = vsel %vm445_vm7, %v448_v27, %v461_v22 }
 0x1f9   : > { %v471_v23 = vpop.permute.xlu1 %470 }
 0x1fa   : > { %v469_v24 = vpop.permute.xlu0 %468  ;;  %v493_v32 = vsel %vm335_vm3, %v491_v29, %v471_v23 }
 0x1fb   : > { %v492_v30 = vsel %vm335_vm3, %v490_v12, %v469_v24 }
 0x1fd   : > { %v479_v25 = vpop.permute.xlu1 %478 }
 0x1fe   : > { %v477_v26 = vpop.permute.xlu0 %476  ;;  %v496_v35 = vsel %vm494_vm8, %v493_v32, %v479_v25 }
 0x1ff   : > { %v495_v33 = vsel %vm494_vm8, %v492_v30, %v477_v26 }
 0x201   : > { %v487_v31 = vpop.permute.xlu1 %486 }
 0x202   : > { %v485_v34 = vpop.permute.xlu0 %484  ;;  %v499_v37 = vsel %vm497_vm9, %v496_v35, %v487_v31 }
 0x203   : > { %v498_v36 = vsel %vm497_vm9, %v495_v33, %v485_v34 }
 0x204   : > { %886 = vmatprep.mubr.msk.f32.mxu1 %vm522_vm10, %v498_v36 }
 0x205   : > { %887 = vmatmul.mubr.msk.f32.vlgmr.msra.gmra.mrb[0].mxu1 %vm522_vm10, %v499_v37 }
 0x2d8   : > { %v888_v42 = vpop.f32.mrb[0].mxu1 }
 0x2d9   : > { %v601_v43 = vadd.f32 %v888_v42, %v788_v40  ;;  %v595_v44 = vpop.f32.mrb[1].mxu1 }
 0x2da   : > { %v596_v46 = vadd.f32 %v788_v40, %v595_v44 }
 0x2db   : > { %v605_v48 = vmax.f32 %v601_v43, 0.0 }
 0x2dc   : > { %v604_v49 = vmax.f32 %v596_v46, 0.0 }
 0x2dd   : > { %v697_v50 = vadd.f32 %v693_v45, %v605_v48 }
 0x2de   : > { %v696_v51 = vadd.f32 %v688_v47, %v604_v49 }
 0x2df   : > { %v699_v52 = vmax.f32 %v697_v50, 0.0 }
 0x2e0   : > { %v698_v53 = vmax.f32 %v696_v51, 0.0 }
 0x2e1   : > { %701 = vst.msk [vmem:[%s272_s13 + $0x8] sm:$0xff] %vm445_vm7, %v699_v52 }
 0x2e2   : > { %700 = vst.msk [vmem:[%s272_s13] sm:$0xff] %vm445_vm7, %v698_v53 }
 0x2e3   : > { %1010 = shalt.err (!%p1007_p3)
}
 0x2e4   : > { %s1011_s9 = scalar_lea.hbm %s1285_s29, 256  ;;  %s1015_s19 = scalar_lea.hbm %s1339_s7, 1024 }
 0x2e5   : > { %p1012_p4 = scmp.ne.s32.totalorder %s1285_s29, %s1011_s9  ;;  %p1016_p9 = scmp.lt.u32.totalorder %s1285_s29, %s1339_s7 }
 0x2e6   : > { %p1017_p10 = scmp.lt.u32.totalorder %s1015_s19, %s1011_s9  ;;  %p1019_p12 = scmp.lt.u32.totalorder %s1011_s9, %s1285_s29 }
 0x2e7   : > { %p1013_p7 = pnand %p1012_p4, %p1150_p5 }
 0x2e8   : > { %p1018_p11 = por %p1017_p10, %p1016_p9 }
 0x2e9   : > { %p1014_p8 = pneg %p1013_p7 }
 0x2ea   : > { %p1020_p13 = por %p1019_p12, %p1018_p11 }
 0x2ec   : > { %p1021_p0 = pnand %p1020_p13, %p1014_p8 }
 0x2ee   : > { %1024 = shalt.err (!%p1021_p0)
}
 0x2ef   : > { %s1070_s22 = smov 128   ;;  %s1071_s23 = smov 8  }
 0x2f0   : > { %948 = dma.vmem_to_hbm [thread:$0]  (%p1150_p5), %s1287_s21, 256, %s1285_s29, %s1291_s28, %s1070_s22, %s1070_s22, %s1071_s23  }
 0x2f1 PF: > { %p954_p1 = scmp.ge.s32.totalorder %s1059_s27, 2  ;;  %s731_s8 = sand.u32 1, %s1047_s24  }
 0x2f2   : > { %s732_s14 = scalar_lea.sflag [#allocation5], %s731_s8 }
 0x2f3   : > { %p951_p2 = pnand %p954_p1, %p1154_p6 }
 0x2f5   : > { %1042 = dma.done.wait (!%p951_p2), %s732_s14, 256  }
 0x2f6   : > { %1044 = vsyncadd (!%p951_p2), %s732_s14, 4294967040  ;;  %p17_p3 = scmp.ge.s32.totalorder %s1137_s30, 6   ;;  %s1342_s24 = smov %s1051_s25 }
 0x2f7   : > { %s1343_s25 = smov %s1055_s26  ;;  %s1344_s26 = smov %s1148_s10 }
 0x2f8   : > { %s1345_s27 = smov %s1137_s30  ;;  %19 = sbr.rel (!%p17_p3) target bundleno = 3 (0x3), region = 83 }
 0x2ff   :  { %737 = vsyncpa [#allocation5], 1 }
 0x300   :  { %739 = vsyncpa [#allocation5 + $0x1], 1 }

</bundles_post_ra>
